<compile_context>
chip_gen: v5e
topology: v5e:2x2
jax: 0.10.0
libtpu: 0.0.40
codegen_flags: <defaults>
</compile_context>

<pallas_src>
import math

import jax
import jax.numpy as jnp
from jax.experimental import pallas as pl
from jax.experimental.pallas import tpu as pltpu


def _msl_compute(x_ref, w_ref, b_ref, o_ref, acc_ref):
    # x_ref: (TS, tm, tk), w_ref: (TS, tk, tn), b_ref: (TS, 1, tn) or None,
    # o_ref: (TS, tm, tn), acc_ref: (TS, tm, tn) f32.
    k = pl.program_id(3)
    nk = pl.num_programs(3)

    @pl.when(k == 0)
    def _init():
        acc_ref[...] = jnp.zeros_like(acc_ref)

    # Batched matmul over the TS sources held in this block (MXU, f32 acc).
    acc_ref[...] += jnp.einsum(
        "smk,skn->smn",
        x_ref[...],
        w_ref[...],
        preferred_element_type=jnp.float32,
    )

    @pl.when(k == nk - 1)
    def _finalize():
        acc = acc_ref[...]
        if b_ref is not None:
            acc = acc + b_ref[...].astype(jnp.float32)  # (TS,1,tn) broadcast
        o_ref[...] = acc.astype(o_ref.dtype)


def _msl_kernel_bias(x_ref, w_ref, b_ref, o_ref, acc_ref):
    _msl_compute(x_ref, w_ref, b_ref, o_ref, acc_ref)


def _msl_kernel_nobias(x_ref, w_ref, o_ref, acc_ref):
    _msl_compute(x_ref, w_ref, None, o_ref, acc_ref)


def _round_up(x, m):
    return (x + m - 1) // m * m


def _pick_tile(padded, candidates):
    for c in candidates:
        if padded % c == 0:
            return c
    return candidates[-1]


def multi_source_linear(x, weight, bias_weight=None):
    """x: (..., S, Din), weight: (S, Din, Dout), bias_weight: (S, Dout) or None."""
    *lead, S, Din = x.shape
    S_w, Din_w, Dout = weight.shape
    assert S == S_w and Din == Din_w

    B = math.prod(lead) if lead else 1
    dtype = x.dtype
    itemsize = jnp.dtype(dtype).itemsize

    # ---- layout: put S in front (squeezable), (B, Din)/(B, Dout) trailing ----
    x3 = x.reshape(B, S, Din).transpose(1, 0, 2)  # (S, B, Din)

    # ---- tile sizes (conservative across v5e / v6e / v7x) ----
    B_pad = _round_up(B, 8)                       # sublane multiple (f32)
    tm = _pick_tile(B_pad, (256, 128, 64, 32, 16, 8))

    Dn_pad = _round_up(Dout, 128)                 # lane-dense output stores
    tn = _pick_tile(Dn_pad, (512, 256, 128))

    if Din <= 1024:                               # single K step, no Din padding
        Din_pad, tk = Din, Din
    else:                                         # K tiling for large Din
        tk = 512
        Din_pad = _round_up(Din, tk)

    # Sources per grid step: amortize per-step overhead while keeping the
    # weight tile (TS, tk, tn) at <= ~512 KiB.
    ts = max(1, min(S, 16, (512 * 1024 // itemsize) // max(tk * tn, 1)))
    S_pad = _round_up(S, ts)

    # ---- pad operands (zeros; padded rows/cols are sliced away) ----
    x_p = jnp.pad(x3, ((0, S_pad - S), (0, B_pad - B), (0, Din_pad - Din)))
    w_p = jnp.pad(weight, ((0, S_pad - S), (0, Din_pad - Din), (0, Dn_pad - Dout)))

    in_specs = [
        # x: (TS, tm, tk); block index independent of the N axis.
        pl.BlockSpec((ts, tm, tk), lambda s, n, m, k: (s, m, k)),
        # weight: (TS, tk, tn); independent of the M axis -> reused across B tiles.
        pl.BlockSpec((ts, tk, tn), lambda s, n, m, k: (s, k, n)),
    ]
    inputs = [x_p, w_p]

    if bias_weight is not None:
        b_p = jnp.pad(
            bias_weight.reshape(S, 1, Dout),
            ((0, S_pad - S), (0, 0), (0, Dn_pad - Dout)),
        )
        in_specs.append(pl.BlockSpec((ts, 1, tn), lambda s, n, m, k: (s, 0, n)))
        inputs.append(b_p)
        kernel = _msl_kernel_bias
    else:
        kernel = _msl_kernel_nobias

    grid = (S_pad // ts, Dn_pad // tn, B_pad // tm, Din_pad // tk)

    out_p = pl.pallas_call(
        kernel,
        out_shape=jax.ShapeDtypeStruct((S_pad, B_pad, Dn_pad), dtype),
        grid_spec=pltpu.PrefetchScalarGridSpec(
            num_scalar_prefetch=0,
            grid=grid,
            in_specs=in_specs,
            out_specs=pl.BlockSpec((ts, tm, tn), lambda s, n, m, k: (s, m, n)),
            scratch_shapes=[pltpu.VMEM((ts, tm, tn), jnp.float32)],
        ),
        compiler_params=pltpu.CompilerParams(
            # S and N tiles shard across TensorCores (v7x megacore); M kept
            # sequential for weight-tile reuse; K is the reduction axis.
            dimension_semantics=("parallel", "parallel", "arbitrary", "arbitrary"),
            # Explicit scoped-VMEM limit; tile caps keep usage far below this
            # on all of v5e (128 MiB phys), v6e (128 MiB) and v7x (64 MiB).
            vmem_limit_bytes=32 * 1024 * 1024,
        ),
    )(*inputs)

    out = out_p[:S, :B, :Dout].transpose(1, 0, 2)  # (B, S, Dout)
    return out.reshape(*lead, S, Dout)


if __name__ == "__main__":
    key = jax.random.PRNGKey(0)
    k_x, k_w, k_b = jax.random.split(key, 3)

    B, n_sources, dim_in, dim_out = 2, 3, 32, 16

    x = jax.random.normal(k_x, (B, n_sources, dim_in), dtype=jnp.float32)
    weight = jax.random.normal(k_w, (n_sources, dim_in, dim_out), dtype=jnp.float32)
    # Module initializes bias to zeros; use a random bias here to actually
    # exercise the bias path numerically.
    bias_weight = 0.1 * jax.random.normal(k_b, (n_sources, dim_out), dtype=jnp.float32)

    # bias=True path
    out = jax.block_until_ready(multi_source_linear(x, weight, bias_weight))
    ref = jnp.einsum("...i,...io->...o", x, weight) + bias_weight
    assert out.shape == (B, n_sources, dim_out)
    assert jnp.allclose(out, ref, atol=1e-5, rtol=1e-5)

    # bias=False path (no bias operand is created or DMAed)
    out_nb = jax.block_until_ready(multi_source_linear(x, weight, None))
    ref_nb = jnp.einsum("...i,...io->...o", x, weight)
    assert jnp.allclose(out_nb, ref_nb, atol=1e-5, rtol=1e-5)

    print("KERNEL_OK")
</pallas_src>

<mosaic_0001>
module attributes {stable_mosaic.version = 11 : i64} {
  func.func @_msl_kernel_bias(%arg0: i32, %arg1: i32, %arg2: i32, %arg3: i32, %arg4: memref<3x8x32xf32, #tpu.memory_space<vmem>>, %arg5: memref<3x32x128xf32, #tpu.memory_space<vmem>>, %arg6: memref<3x1x128xf32, #tpu.memory_space<vmem>>, %arg7: memref<3x8x128xf32, #tpu.memory_space<vmem>>, %arg8: memref<3x8x128xf32, #tpu.memory_space<vmem>>) attributes {dimension_semantics = [#tpu.dimension_semantics<parallel>, #tpu.dimension_semantics<parallel>, #tpu.dimension_semantics<arbitrary>, #tpu.dimension_semantics<arbitrary>], iteration_bounds = array<i64: 1, 1, 1, 1>, scalar_prefetch = 0 : i64, scratch_operands = 1 : i64, tpu.core_type = #tpu.core_type<tc>, window_params = [{transform_indices = @transform_0, window_bounds = array<i64: 3, 8, 32>}, {transform_indices = @transform_1, window_bounds = array<i64: 3, 32, 128>}, {transform_indices = @transform_2, window_bounds = array<i64: 3, 1, 128>}, {transform_indices = @transform_3, window_bounds = array<i64: 3, 8, 128>}]} {
    %c0_i32 = arith.constant 0 : i32
    %0 = arith.cmpi eq, %arg3, %c0_i32 : i32
    %1 = arith.extui %0 : i1 to i32
    %c0_i32_0 = arith.constant 0 : i32
    %2 = arith.cmpi ne, %1, %c0_i32_0 : i32
    scf.if %2 {
      %cst_14 = arith.constant 0.000000e+00 : f32
      %12 = vector.broadcast %cst_14 : f32 to vector<3x8x128xf32>
      %c0_15 = arith.constant 0 : index
      %c0_16 = arith.constant 0 : index
      %c0_17 = arith.constant 0 : index
      %13 = vector.load %arg8[%c0_15, %c0_16, %c0_17] : memref<3x8x128xf32, #tpu.memory_space<vmem>>, vector<3x8x128xf32>
      tpu.vector_store %arg8[%c0_15, %c0_16, %c0_17], %12 {strides = array<i32>} : memref<3x8x128xf32, #tpu.memory_space<vmem>>, vector<3x8x128xf32>,
    } else {
    }
    %c0 = arith.constant 0 : index
    %c0_1 = arith.constant 0 : index
    %c0_2 = arith.constant 0 : index
    %3 = vector.load %arg8[%c0, %c0_1, %c0_2] : memref<3x8x128xf32, #tpu.memory_space<vmem>>, vector<3x8x128xf32>
    %c0_3 = arith.constant 0 : index
    %c0_4 = arith.constant 0 : index
    %c0_5 = arith.constant 0 : index
    %4 = vector.load %arg4[%c0_3, %c0_4, %c0_5] : memref<3x8x32xf32, #tpu.memory_space<vmem>>, vector<3x8x32xf32>
    %c0_6 = arith.constant 0 : index
    %c0_7 = arith.constant 0 : index
    %c0_8 = arith.constant 0 : index
    %5 = vector.load %arg5[%c0_6, %c0_7, %c0_8] : memref<3x32x128xf32, #tpu.memory_space<vmem>>, vector<3x32x128xf32>
    "tpu.trace_start"() <{level = 10 : i32, message = "smk,skn->smn"}> : () -> ()
    %cst = arith.constant dense<0.000000e+00> : vector<3x8x128xf32>
    %6 = tpu.matmul %4, %5, %cst {dimension_numbers = #tpu.dot_dimension_numbers<[2], [1], [1], [2], [0, 0, 0, 1, 1, 2], [0], [0]>} : vector<3x8x32xf32>, vector<3x32x128xf32>, vector<3x8x128xf32> -> vector<3x8x128xf32>
    "tpu.trace_stop"() : () -> ()
    %7 = arith.addf %3, %6 : vector<3x8x128xf32>
    %c0_9 = arith.constant 0 : index
    %c0_10 = arith.constant 0 : index
    %c0_11 = arith.constant 0 : index
    %8 = vector.load %arg8[%c0_9, %c0_10, %c0_11] : memref<3x8x128xf32, #tpu.memory_space<vmem>>, vector<3x8x128xf32>
    tpu.vector_store %arg8[%c0_9, %c0_10, %c0_11], %7 {strides = array<i32>} : memref<3x8x128xf32, #tpu.memory_space<vmem>>, vector<3x8x128xf32>,
    %c0_i32_12 = arith.constant 0 : i32
    %9 = arith.cmpi eq, %arg3, %c0_i32_12 : i32
    %10 = arith.extui %9 : i1 to i32
    %c0_i32_13 = arith.constant 0 : i32
    %11 = arith.cmpi ne, %10, %c0_i32_13 : i32
    scf.if %11 {
      %c0_14 = arith.constant 0 : index
      %c0_15 = arith.constant 0 : index
      %c0_16 = arith.constant 0 : index
      %12 = vector.load %arg8[%c0_14, %c0_15, %c0_16] : memref<3x8x128xf32, #tpu.memory_space<vmem>>, vector<3x8x128xf32>
      %c0_17 = arith.constant 0 : index
      %c0_18 = arith.constant 0 : index
      %c0_19 = arith.constant 0 : index
      %13 = vector.load %arg6[%c0_17, %c0_18, %c0_19] : memref<3x1x128xf32, #tpu.memory_space<vmem>>, vector<3x1x128xf32>
      %14 = vector.broadcast %13 : vector<3x1x128xf32> to vector<3x8x128xf32>
      %15 = arith.addf %12, %14 : vector<3x8x128xf32>
      %c0_20 = arith.constant 0 : index
      %c0_21 = arith.constant 0 : index
      %c0_22 = arith.constant 0 : index
      %16 = vector.load %arg7[%c0_20, %c0_21, %c0_22] : memref<3x8x128xf32, #tpu.memory_space<vmem>>, vector<3x8x128xf32>
      tpu.vector_store %arg7[%c0_20, %c0_21, %c0_22], %15 {strides = array<i32>} : memref<3x8x128xf32, #tpu.memory_space<vmem>>, vector<3x8x128xf32>,
    } else {
    }
    return
  }
  func.func @transform_0(%arg0: i32, %arg1: i32, %arg2: i32, %arg3: i32) -> (i32, i32, i32) {
    %c0_i32 = arith.constant 0 : i32
    return %arg0, %arg2, %arg3 : i32, i32, i32
  }
  func.func @transform_1(%arg0: i32, %arg1: i32, %arg2: i32, %arg3: i32) -> (i32, i32, i32) {
    %c0_i32 = arith.constant 0 : i32
    return %arg0, %arg3, %arg1 : i32, i32, i32
  }
  func.func @transform_2(%arg0: i32, %arg1: i32, %arg2: i32, %arg3: i32) -> (i32, i32, i32) {
    %c0_i32 = arith.constant 0 : i32
    %c0_i32_0 = arith.constant 0 : i32
    return %arg0, %c0_i32, %arg1 : i32, i32, i32
  }
  func.func @transform_3(%arg0: i32, %arg1: i32, %arg2: i32, %arg3: i32) -> (i32, i32, i32) {
    %c0_i32 = arith.constant 0 : i32
    return %arg0, %arg2, %arg1 : i32, i32, i32
  }
}

</mosaic_0001>

<bundles_post_ra>
// kernel: tpu_custom_call.1
= control target key start
LH: loop header
LB: loop body
LE: loop exit
PB: predicated region body
PF: predicated region fallthrough
CT: control target
= control target key end

     0   :  { %8 = vsyncpa [#allocation4], 0  ;;  %s372_s0 = inlined_call_operand.hbm [shape: f32[3,8,32], index: 0, kind: input, shape index: {}]   ;;  %s373_s1 = inlined_call_operand.hbm [shape: f32[3,32,128], index: 1, kind: input, shape index: {}]   ;;  %s374_s2 = inlined_call_operand.hbm [shape: f32[3,1,128], index: 2, kind: input, shape index: {}]   ;;  %s375_s3 = inlined_call_operand.hbm [shape: f32[3,8,128], index: 3, kind: output, shape index: {}]  }
   0x1   :  { %9 = vsyncpa [#allocation7], 0 }
   0x2   :  { %10 = vsyncpa [#allocation5], 0  ;;  %s28_s14 = sshll.u32 %s373_s1, 4  ;;  %s323_s15 = smov [#allocation6]   ;;  %s29_s14 = int_to_ptr.hbm [resolvable:$true] %s28_s14 }
   0x3   :  { %s30_s16 = sshll.u32 %s323_s15, 4  ;;  %s15_s19 = sshll.u32 %s372_s0, 4  ;;  %s31_s16 = int_to_ptr.vmem [resolvable:$true] %s30_s16  ;;  %s16_s19 = int_to_ptr.hbm [resolvable:$true] %s15_s19 }
   0x4   :  { %s324_s20 = smov 128   ;;  %s325_s21 = smov 8  }
   0x5   :  { %36 = dma.hbm_to_vmem [thread:$0]  %s29_s14, 1536, %s31_s16, [#allocation7], %s324_s20, %s324_s20, %s325_s21  }
   0x6   :  { %s326_s22 = smov [#allocation3]   ;;  %s41_s1 = sshll.u32 %s374_s2, 4  ;;  %s42_s1 = int_to_ptr.hbm [resolvable:$true] %s41_s1 }
   0x7   :  { %s17_s23 = sshll.u32 %s326_s22, 4  ;;  %s327_s0 = smov [#allocation8]   ;;  %s18_s23 = int_to_ptr.vmem [resolvable:$true] %s17_s23 }
   0x8   :  { %23 = dma.hbm_to_vmem [thread:$0]  %s16_s19, 384, %s18_s23, [#allocation4], %s324_s20, %s324_s20, %s325_s21  }
   0x9   :  { %s43_s26 = sshll.u32 %s327_s0, 4  ;;  %s328_s27 = smov 16   ;;  %s44_s26 = int_to_ptr.vmem [resolvable:$true] %s43_s26 }
   0xa   :  { %s329_s28 = smov 1  }
   0xb   :  { %49 = dma.hbm_to_vmem [thread:$0]  %s42_s1, 48, %s44_s26, [#allocation7], %s328_s27, %s328_s27, %s329_s28  }
   0xc   :  { %317 = dma.done.wait [#allocation4], 384  }
   0xd   :  { %318 = vsyncadd [#allocation4], 4294966912 }
   0xe   :  { %319 = dma.done.wait [#allocation7], 1584  }
   0xf   :  { %320 = vsyncadd [#allocation7], 4294965712  ;;  %v86_v0 = vld [vmem:[#allocation6 + $0x58] sm:$0xff]  ;;  %v85_v1 = vld [vmem:[#allocation6 + $0x50] sm:$0xff]  ;;  %vm87_vm0 = vcmask 261120   ;;  %s330_s2 = smov [#allocation9]  }
  0x10   :  { %149 = vmatpush.msra.mxu2 %v86_v0  ;;  %v78_v2 = vld [vmem:[#allocation6 + $0x18] sm:$0xff]  ;;  %v84_v4 = vld [vmem:[#allocation6 + $0x48] sm:$0xff]  ;;  %v77_v5 = vld [vmem:[#allocation6 + $0x10] sm:$0xff]  ;;  %s191_s29 = sshll.u32 %s330_s2, 4  ;;  %s193_s5 = sshll.u32 %s375_s3, 4  ;;  %s192_s29 = int_to_ptr.vmem [resolvable:$true] %s191_s29  ;;  %s194_s5 = int_to_ptr.hbm [resolvable:$true] %s193_s5 }
  0x11   :  { %v82_v3 = vld [vmem:[#allocation6 + $0x38] sm:$0xff]  ;;  %103 = vmatpush.msra.mxu0 %v78_v2  ;;  %v81_v6 = vld [vmem:[#allocation6 + $0x30] sm:$0xff]  ;;  %v76_v7 = vld [vmem:[#allocation6 + $0x8] sm:$0xff] }
  0x12   :  { %126 = vmatpush.msra.mxu1 %v82_v3  ;;  %150 = vmatpush.msra.mxu2 %v85_v1  ;;  %v80_v8 = vld [vmem:[#allocation6 + $0x28] sm:$0xff]  ;;  %v83_v9 = vld [vmem:[#allocation6 + $0x40] sm:$0xff]  ;;  %v74_v10 = vld [vmem:[#allocation3 + $0x10] sm:$0xff] }
  0x13   :  { %104 = vmatpush.msra.mxu0 %v77_v5  ;;  %v75_v11 = vld [vmem:[#allocation6] sm:$0xff]  ;;  %v72_v13 = vld [vmem:[#allocation3] sm:$0xff]  ;;  %v73_v14 = vld [vmem:[#allocation3 + $0x8] sm:$0xff] }
  0x14   :  { %127 = vmatpush.msra.mxu1 %v81_v6  ;;  %151 = vmatpush.msra.mxu2 %v84_v4  ;;  %v79_v12 = vld [vmem:[#allocation6 + $0x20] sm:$0xff] }
  0x15   :  { %105 = vmatpush.msra.mxu0 %v76_v7  ;;  %v218_v15 = vld [vmem:[#allocation8] ss:$0 sm:$0xff]  ;;  %v219_v16 = vld [vmem:[#allocation8 + $0x1] ss:$0 sm:$0xff]  ;;  %v220_v21 = vld [vmem:[#allocation8 + $0x2] ss:$0 sm:$0xff] }
  0x16   :  { %128 = vmatpush.msra.mxu1 %v80_v8  ;;  %152 = vmatpush.msra.mxu2 %v83_v9 }
  0x17   :  { %209 = vmatmul.msk.f32.vlgmr.msra.gmra.mxu2 %vm87_vm0, %v74_v10  ;;  %106 = vmatpush.msra.mxu0 %v75_v11 }
  0x18   :  { %129 = vmatpush.msra.mxu1 %v79_v12  ;;  %207 = vmatmul.msk.f32.vlgmr.msra.gmra.mxu0 %vm87_vm0, %v72_v13 }
  0x19   :  { %208 = vmatmul.msk.f32.vlgmr.msra.gmra.mxu1 %vm87_vm0, %v73_v14 }
  0x95   :  { %v108_v17 = vpop.f32.mrf.mxu0 }
  0x96   :  { %v181_v18 = vadd.f32 %v218_v15, %v108_v17  ;;  %v131_v19 = vpop.f32.mrf.mxu1 }
  0x97   :  { %v182_v20 = vadd.f32 %v219_v16, %v131_v19 }
  0x98   :  { %184 = vst [vmem:[#allocation9] sm:$0xff] %v181_v18 }
  0x99   :  { %185 = vst [vmem:[#allocation9 + $0x8] sm:$0xff] %v182_v20 }
  0x9a   :  { %v154_v22 = vpop.f32.mrf.mxu2 }
  0x9b   :  { %v183_v23 = vadd.f32 %v220_v21, %v154_v22 }
  0x9d   :  { %186 = vst [vmem:[#allocation9 + $0x10] sm:$0xff] %v183_v23 }
  0x9e   :  { %199 = dma.vmem_to_hbm [thread:$0]  %s192_s29, 384, %s194_s5, [#allocation5], %s324_s20, %s324_s20, %s325_s21  }
  0x9f   :  { %321 = dma.done.wait [#allocation5], 384  }
  0xa0   :  { %322 = vsyncadd [#allocation5], 4294966912 }
  0xa1   :  { %204 = vsyncpa [#allocation4], 1 }
  0xa2   :  { %205 = vsyncpa [#allocation7], 1 }
  0xa3   :  { %206 = vsyncpa [#allocation5], 1 }

</bundles_post_ra>
